<compile_context>
chip_gen: v7x
topology: tpu7x:2x2x1
jax: 0.10.0
libtpu: 0.0.40
codegen_flags: <defaults>
</compile_context>

<pallas_src>
import math
import functools

import jax
import jax.numpy as jnp
from jax.experimental import pallas as pl
from jax.experimental.pallas import tpu as pltpu


def _round_up(x, m):
    return (x + m - 1) // m * m


# ----------------------------- Pallas kernel ------------------------------- #
def _embed_norm_kernel(x_ref, wT_ref, b_ref, g1_ref, be1_ref, g2_ref, be2_ref,
                       o_ref, *, xscale, eps, d_valid):
    """Fused Linear + LayerNorm + (x * sqrt(d)) + after_norm LayerNorm.

    The feature dim may be zero-padded to a lane multiple; all reductions
    divide by the real feature count `d_valid`, and padded gamma/beta/bias
    lanes are zero so the padded lanes stay exactly zero through both norms.
    """
    # MXU matmul in the stored operand dtype (bf16/f32), f32 accumulate.
    y = jnp.dot(x_ref[...], wT_ref[...], preferred_element_type=jnp.float32)
    y = y + b_ref[...]                                     # (tm, Dp) f32

    inv_d = jnp.float32(1.0 / d_valid)

    # LayerNorm of LinearNoSubsampling.out[1]  (single-pass variance)
    mu1 = jnp.sum(y, axis=-1, keepdims=True) * inv_d
    ms1 = jnp.sum(y * y, axis=-1, keepdims=True) * inv_d
    var1 = ms1 - mu1 * mu1
    y = (y - mu1) * jax.lax.rsqrt(var1 + eps) * g1_ref[...] + be1_ref[...]

    # EspnetRelPositionalEncoding: x = x * sqrt(d_model); dropout = identity (eval)
    y = y * xscale

    # after_norm LayerNorm (normalize_before=True)
    mu2 = jnp.sum(y, axis=-1, keepdims=True) * inv_d
    ms2 = jnp.sum(y * y, axis=-1, keepdims=True) * inv_d
    var2 = ms2 - mu2 * mu2
    y = (y - mu2) * jax.lax.rsqrt(var2 + eps) * g2_ref[...] + be2_ref[...]

    o_ref[...] = y.astype(o_ref.dtype)


def embed_and_norm(xs_2d, wT, b, g1, be1, g2, be2, *, xscale, eps=1e-5, tm=256):
    """xs_2d: (N, D_in) -> (N, D_out) via the fused kernel over row tiles."""
    N, d_in = xs_2d.shape
    d_out = wT.shape[1]

    # Lane-dense output: pad feature dim to a multiple of 128.
    d_pad = _round_up(d_out, 128)
    # Row tile: multiple of 8 sublanes, no larger than the (8-rounded) row count.
    tm = max(8, min(tm, _round_up(N, 8)))
    tm = (tm // 8) * 8
    N_pad = _round_up(N, tm)

    if N_pad != N:
        xs_2d = jnp.pad(xs_2d, ((0, N_pad - N), (0, 0)))
    if d_pad != d_out:
        pad_f = ((0, 0), (0, d_pad - d_out))
        wT = jnp.pad(wT, pad_f)
        b, g1, be1, g2, be2 = (jnp.pad(v, pad_f) for v in (b, g1, be1, g2, be2))

    grid = (N_pad // tm,)
    row_spec_in = pl.BlockSpec((tm, d_in), lambda i: (i, 0))
    row_spec_out = pl.BlockSpec((tm, d_pad), lambda i: (i, 0))
    full_w_spec = pl.BlockSpec((d_in, d_pad), lambda i: (0, 0))
    vec_spec = pl.BlockSpec((1, d_pad), lambda i: (0, 0))

    # VMEM budget: double-buffered x/out tiles + resident weight/vectors +
    # f32 intermediates.  Clamped so it stays valid on v7x (64 MiB physical).
    in_isz = xs_2d.dtype.itemsize
    w_isz = wT.dtype.itemsize
    vmem_bytes = (2 * tm * d_in * in_isz          # x tiles (double-buffered)
                  + 2 * tm * d_pad * in_isz       # out tiles (double-buffered)
                  + 2 * d_in * d_pad * w_isz      # resident weight
                  + 2 * 5 * d_pad * 4             # bias/gamma/beta vectors
                  + 6 * tm * d_pad * 4)           # f32 intermediates headroom
    vmem_bytes = int(min(max(vmem_bytes, 4 << 20), 60 << 20))

    kernel = functools.partial(_embed_norm_kernel, xscale=xscale, eps=eps,
                               d_valid=d_out)
    out = pl.pallas_call(
        kernel,
        out_shape=jax.ShapeDtypeStruct((N_pad, d_pad), xs_2d.dtype),
        grid_spec=pltpu.PrefetchScalarGridSpec(
            num_scalar_prefetch=0,
            grid=grid,
            in_specs=[row_spec_in, full_w_spec, vec_spec, vec_spec, vec_spec,
                      vec_spec, vec_spec],
            out_specs=row_spec_out,
        ),
        compiler_params=pltpu.CompilerParams(
            dimension_semantics=("parallel",),
            vmem_limit_bytes=vmem_bytes),
    )(xs_2d, wT, b, g1, be1, g2, be2)
    return out[:N, :d_out]


# ----------------------------- plain-JAX glue ------------------------------ #
def make_rel_pe(max_len, d_model, dtype=jnp.float32):
    """EspnetRelPositionalEncoding.extend_pe buffer, shape (1, 2*max_len-1, d)."""
    position = jnp.arange(max_len, dtype=jnp.float32)[:, None]
    div_term = jnp.exp(jnp.arange(0, d_model, 2, dtype=jnp.float32) *
                       (-(math.log(10000.0) / d_model)))
    ang = position * div_term
    pe_pos = jnp.zeros((max_len, d_model), jnp.float32)
    pe_pos = pe_pos.at[:, 0::2].set(jnp.sin(ang)).at[:, 1::2].set(jnp.cos(ang))
    pe_neg = jnp.zeros((max_len, d_model), jnp.float32)
    pe_neg = pe_neg.at[:, 0::2].set(jnp.sin(-ang)).at[:, 1::2].set(jnp.cos(-ang))
    pe_pos = jnp.flip(pe_pos, axis=0)[None]       # (1, max_len, d)
    pe_neg = pe_neg[1:][None]                     # (1, max_len-1, d)
    return jnp.concatenate([pe_pos, pe_neg], axis=1).astype(dtype)


def position_encoding(pe, size):
    L = pe.shape[1]
    center = L // 2
    return pe[:, center - size + 1:center + size]   # (1, 2*size-1, d)


def make_non_pad_mask(xs_lens, T):
    """~make_pad_mask(xs_lens, T).unsqueeze(1) -> (B, 1, T) bool, True = valid."""
    t = jnp.arange(T, dtype=xs_lens.dtype)[None, :]
    return (t < xs_lens[:, None])[:, None, :]


class BaseEncoderPallas:
    """JAX/Pallas port of BaseEncoder.forward (eval mode).

    Only modules defined in BaseEncoder.__init__ are implemented:
    embed (Linear + LayerNorm + rel. pos. enc. scale) and after_norm.
    """

    def __init__(self, input_size, output_size, attention_heads, linear_units,
                 num_blocks, normalize_before, static_chunk_size,
                 use_dynamic_chunk, use_dynamic_left_chunk, *,
                 max_len=64, param_dtype=jnp.float32, key=None):
        del attention_heads, linear_units, num_blocks  # no encoder layers in base class
        self.output_size = output_size
        self.normalize_before = normalize_before
        self.static_chunk_size = static_chunk_size
        self.use_dynamic_chunk = use_dynamic_chunk
        self.use_dynamic_left_chunk = use_dynamic_left_chunk
        self.xscale = math.sqrt(output_size)

        key = jax.random.PRNGKey(0) if key is None else key
        kw, kb = jax.random.split(key)
        bound = 1.0 / math.sqrt(input_size)
        # nn.Linear(idim, odim): weight (odim, idim); store transposed, in the
        # compute dtype so the kernel feeds the MXU without a per-step cast.
        self.wT = jax.random.uniform(kw, (input_size, output_size),
                                     jnp.float32, -bound, bound).astype(param_dtype)
        self.b = jax.random.uniform(kb, (1, output_size),
                                    jnp.float32, -bound, bound)
        # LayerNorm(odim) of the embed head
        self.ln1_g = jnp.ones((1, output_size), jnp.float32)
        self.ln1_b = jnp.zeros((1, output_size), jnp.float32)
        # after_norm LayerNorm(odim)
        self.ln2_g = jnp.ones((1, output_size), jnp.float32)
        self.ln2_b = jnp.zeros((1, output_size), jnp.float32)
        # positional-encoding buffer (built once; only sliced if layers exist)
        self.pe = make_rel_pe(max_len, output_size)

    def __call__(self, xs, xs_lens, decoding_chunk_size=0,
                 num_decoding_left_chunks=-1):
        B, T, D = xs.shape
        masks = make_non_pad_mask(xs_lens, T)                       # (B, 1, T)

        # TODO(synk): global_cmvn is not defined in BaseEncoder.__init__; treated as None.
        xs2d = xs.reshape(B * T, D)
        out2d = embed_and_norm(xs2d, self.wT, self.b,
                               self.ln1_g, self.ln1_b,
                               self.ln2_g, self.ln2_b,
                               xscale=self.xscale, tm=256)
        xs_out = out2d.reshape(B, T, self.output_size)

        # TODO(synk): self.encoders / add_optional_chunk_mask are not defined in
        # BaseEncoder.__init__, so forward_layers is the identity and pos_emb
        # (position_encoding(self.pe, T)) is only needed when layers exist.
        return xs_out, masks

    # pure-JAX reference of the same forward path, for correctness checks
    def reference(self, xs, xs_lens):
        B, T, D = xs.shape
        masks = make_non_pad_mask(xs_lens, T)
        y = jnp.einsum("btd,de->bte", xs.astype(jnp.float32),
                       self.wT.astype(jnp.float32)) + self.b[0]

        def ln(v, g, b, eps=1e-5):
            mu = jnp.mean(v, axis=-1, keepdims=True)
            var = jnp.mean((v - mu) ** 2, axis=-1, keepdims=True)
            return (v - mu) * jax.lax.rsqrt(var + eps) * g[0] + b[0]

        y = ln(y, self.ln1_g, self.ln1_b)
        y = y * self.xscale
        y = ln(y, self.ln2_g, self.ln2_b)
        return y.astype(xs.dtype), masks


if __name__ == "__main__":
    B, T = 2, 8
    input_size, output_size = 16, 32

    enc = BaseEncoderPallas(
        input_size=input_size, output_size=output_size, attention_heads=4,
        linear_units=64, num_blocks=0, normalize_before=True,
        static_chunk_size=0, use_dynamic_chunk=False,
        use_dynamic_left_chunk=False, max_len=64,
        key=jax.random.PRNGKey(0))

    kx, kl = jax.random.split(jax.random.PRNGKey(0), 2)
    xs = jax.random.normal(kx, (B, T, input_size), jnp.float32)
    xs_lens = jnp.array([T, T - 3], dtype=jnp.int32)

    ys, masks = enc(xs, xs_lens)
    jax.block_until_ready(ys)
    jax.block_until_ready(masks)

    ys_ref, masks_ref = enc.reference(xs, xs_lens)
    jax.block_until_ready(ys_ref)

    assert ys.shape == (B, T, output_size) and masks.shape == (B, 1, T)
    assert bool(jnp.all(jnp.isfinite(ys)))
    assert bool(jnp.all(masks == masks_ref))
    assert bool(jnp.max(jnp.abs(ys - ys_ref)) < 1e-4)
    print("KERNEL_OK")
</pallas_src>

<mosaic_0001>
module attributes {stable_mosaic.version = 11 : i64} {
  func.func @_embed_norm_kernel(%arg0: i32, %arg1: memref<16x16xf32, #tpu.memory_space<vmem>>, %arg2: memref<16x128xf32, #tpu.memory_space<vmem>>, %arg3: memref<1x128xf32, #tpu.memory_space<vmem>>, %arg4: memref<1x128xf32, #tpu.memory_space<vmem>>, %arg5: memref<1x128xf32, #tpu.memory_space<vmem>>, %arg6: memref<1x128xf32, #tpu.memory_space<vmem>>, %arg7: memref<1x128xf32, #tpu.memory_space<vmem>>, %arg8: memref<16x128xf32, #tpu.memory_space<vmem>>) attributes {dimension_semantics = [#tpu.dimension_semantics<parallel>], iteration_bounds = array<i64: 1>, scalar_prefetch = 0 : i64, scratch_operands = 0 : i64, tpu.core_type = #tpu.core_type<tc>, window_params = [{transform_indices = @transform_0, window_bounds = array<i64: 16, 16>}, {pipeline_mode = #tpu.pipeline_mode<synchronous>, transform_indices = @transform_1, window_bounds = array<i64: 16, 128>}, {pipeline_mode = #tpu.pipeline_mode<synchronous>, transform_indices = @transform_2, window_bounds = array<i64: 1, 128>}, {pipeline_mode = #tpu.pipeline_mode<synchronous>, transform_indices = @transform_3, window_bounds = array<i64: 1, 128>}, {pipeline_mode = #tpu.pipeline_mode<synchronous>, transform_indices = @transform_4, window_bounds = array<i64: 1, 128>}, {pipeline_mode = #tpu.pipeline_mode<synchronous>, transform_indices = @transform_5, window_bounds = array<i64: 1, 128>}, {pipeline_mode = #tpu.pipeline_mode<synchronous>, transform_indices = @transform_6, window_bounds = array<i64: 1, 128>}, {transform_indices = @transform_7, window_bounds = array<i64: 16, 128>}]} {
    %c0 = arith.constant 0 : index
    %c0_0 = arith.constant 0 : index
    %0 = vector.load %arg1[%c0, %c0_0] : memref<16x16xf32, #tpu.memory_space<vmem>>, vector<16x16xf32>
    %c0_1 = arith.constant 0 : index
    %c0_2 = arith.constant 0 : index
    %1 = vector.load %arg2[%c0_1, %c0_2] : memref<16x128xf32, #tpu.memory_space<vmem>>, vector<16x128xf32>
    %cst = arith.constant dense<0.000000e+00> : vector<16x128xf32>
    %2 = tpu.matmul %0, %1, %cst {dimension_numbers = #tpu.dot_dimension_numbers<[1], [0], [0], [1], [0, 0, 1, 1], [], []>} : vector<16x16xf32>, vector<16x128xf32>, vector<16x128xf32> -> vector<16x128xf32>
    %c0_3 = arith.constant 0 : index
    %c0_4 = arith.constant 0 : index
    %3 = vector.load %arg3[%c0_3, %c0_4] : memref<1x128xf32, #tpu.memory_space<vmem>>, vector<1x128xf32>
    %4 = vector.broadcast %3 : vector<1x128xf32> to vector<16x128xf32>
    %5 = arith.addf %2, %4 : vector<16x128xf32>
    %cst_5 = arith.constant dense<0.000000e+00> : vector<16xf32>
    %6 = vector.multi_reduction <add>, %5, %cst_5 [1] : vector<16x128xf32> to vector<16xf32>
    %7 = vector.shape_cast %6 : vector<16xf32> to vector<16x1xf32>
    %cst_6 = arith.constant 3.125000e-02 : f32
    %8 = vector.broadcast %cst_6 : f32 to vector<16x1xf32>
    %9 = arith.mulf %7, %8 : vector<16x1xf32>
    %10 = arith.mulf %5, %5 : vector<16x128xf32>
    %cst_7 = arith.constant dense<0.000000e+00> : vector<16xf32>
    %11 = vector.multi_reduction <add>, %10, %cst_7 [1] : vector<16x128xf32> to vector<16xf32>
    %12 = vector.shape_cast %11 : vector<16xf32> to vector<16x1xf32>
    %cst_8 = arith.constant 3.125000e-02 : f32
    %13 = vector.broadcast %cst_8 : f32 to vector<16x1xf32>
    %14 = arith.mulf %12, %13 : vector<16x1xf32>
    %15 = arith.mulf %9, %9 : vector<16x1xf32>
    %16 = arith.subf %14, %15 : vector<16x1xf32>
    %17 = vector.broadcast %9 : vector<16x1xf32> to vector<16x128xf32>
    %18 = arith.subf %5, %17 : vector<16x128xf32>
    %cst_9 = arith.constant 9.99999974E-6 : f32
    %19 = vector.broadcast %cst_9 : f32 to vector<16x1xf32>
    %20 = arith.addf %16, %19 : vector<16x1xf32>
    %21 = math.rsqrt %20 : vector<16x1xf32>
    %22 = vector.broadcast %21 : vector<16x1xf32> to vector<16x128xf32>
    %23 = arith.mulf %18, %22 : vector<16x128xf32>
    %c0_10 = arith.constant 0 : index
    %c0_11 = arith.constant 0 : index
    %24 = vector.load %arg4[%c0_10, %c0_11] : memref<1x128xf32, #tpu.memory_space<vmem>>, vector<1x128xf32>
    %25 = vector.broadcast %24 : vector<1x128xf32> to vector<16x128xf32>
    %26 = arith.mulf %23, %25 : vector<16x128xf32>
    %c0_12 = arith.constant 0 : index
    %c0_13 = arith.constant 0 : index
    %27 = vector.load %arg5[%c0_12, %c0_13] : memref<1x128xf32, #tpu.memory_space<vmem>>, vector<1x128xf32>
    %28 = vector.broadcast %27 : vector<1x128xf32> to vector<16x128xf32>
    %29 = arith.addf %26, %28 : vector<16x128xf32>
    %cst_14 = arith.constant 5.65685415 : f32
    %30 = vector.broadcast %cst_14 : f32 to vector<16x128xf32>
    %31 = arith.mulf %29, %30 : vector<16x128xf32>
    %cst_15 = arith.constant dense<0.000000e+00> : vector<16xf32>
    %32 = vector.multi_reduction <add>, %31, %cst_15 [1] : vector<16x128xf32> to vector<16xf32>
    %33 = vector.shape_cast %32 : vector<16xf32> to vector<16x1xf32>
    %cst_16 = arith.constant 3.125000e-02 : f32
    %34 = vector.broadcast %cst_16 : f32 to vector<16x1xf32>
    %35 = arith.mulf %33, %34 : vector<16x1xf32>
    %36 = arith.mulf %31, %31 : vector<16x128xf32>
    %cst_17 = arith.constant dense<0.000000e+00> : vector<16xf32>
    %37 = vector.multi_reduction <add>, %36, %cst_17 [1] : vector<16x128xf32> to vector<16xf32>
    %38 = vector.shape_cast %37 : vector<16xf32> to vector<16x1xf32>
    %cst_18 = arith.constant 3.125000e-02 : f32
    %39 = vector.broadcast %cst_18 : f32 to vector<16x1xf32>
    %40 = arith.mulf %38, %39 : vector<16x1xf32>
    %41 = arith.mulf %35, %35 : vector<16x1xf32>
    %42 = arith.subf %40, %41 : vector<16x1xf32>
    %43 = vector.broadcast %35 : vector<16x1xf32> to vector<16x128xf32>
    %44 = arith.subf %31, %43 : vector<16x128xf32>
    %cst_19 = arith.constant 9.99999974E-6 : f32
    %45 = vector.broadcast %cst_19 : f32 to vector<16x1xf32>
    %46 = arith.addf %42, %45 : vector<16x1xf32>
    %47 = math.rsqrt %46 : vector<16x1xf32>
    %48 = vector.broadcast %47 : vector<16x1xf32> to vector<16x128xf32>
    %49 = arith.mulf %44, %48 : vector<16x128xf32>
    %c0_20 = arith.constant 0 : index
    %c0_21 = arith.constant 0 : index
    %50 = vector.load %arg6[%c0_20, %c0_21] : memref<1x128xf32, #tpu.memory_space<vmem>>, vector<1x128xf32>
    %51 = vector.broadcast %50 : vector<1x128xf32> to vector<16x128xf32>
    %52 = arith.mulf %49, %51 : vector<16x128xf32>
    %c0_22 = arith.constant 0 : index
    %c0_23 = arith.constant 0 : index
    %53 = vector.load %arg7[%c0_22, %c0_23] : memref<1x128xf32, #tpu.memory_space<vmem>>, vector<1x128xf32>
    %54 = vector.broadcast %53 : vector<1x128xf32> to vector<16x128xf32>
    %55 = arith.addf %52, %54 : vector<16x128xf32>
    %c0_24 = arith.constant 0 : index
    %c0_25 = arith.constant 0 : index
    %56 = vector.load %arg8[%c0_24, %c0_25] : memref<16x128xf32, #tpu.memory_space<vmem>>, vector<16x128xf32>
    tpu.vector_store %arg8[%c0_24, %c0_25], %55 {strides = array<i32>} : memref<16x128xf32, #tpu.memory_space<vmem>>, vector<16x128xf32>,
    return
  }
  func.func @transform_0(%arg0: i32) -> (i32, i32) {
    %c0_i32 = arith.constant 0 : i32
    %c0_i32_0 = arith.constant 0 : i32
    return %arg0, %c0_i32 : i32, i32
  }
  func.func @transform_1(%arg0: i32) -> (i32, i32) {
    %c0_i32 = arith.constant 0 : i32
    %c0_i32_0 = arith.constant 0 : i32
    %c0_i32_1 = arith.constant 0 : i32
    return %c0_i32, %c0_i32_0 : i32, i32
  }
  func.func @transform_2(%arg0: i32) -> (i32, i32) {
    %c0_i32 = arith.constant 0 : i32
    %c0_i32_0 = arith.constant 0 : i32
    %c0_i32_1 = arith.constant 0 : i32
    return %c0_i32, %c0_i32_0 : i32, i32
  }
  func.func @transform_3(%arg0: i32) -> (i32, i32) {
    %c0_i32 = arith.constant 0 : i32
    %c0_i32_0 = arith.constant 0 : i32
    %c0_i32_1 = arith.constant 0 : i32
    return %c0_i32, %c0_i32_0 : i32, i32
  }
  func.func @transform_4(%arg0: i32) -> (i32, i32) {
    %c0_i32 = arith.constant 0 : i32
    %c0_i32_0 = arith.constant 0 : i32
    %c0_i32_1 = arith.constant 0 : i32
    return %c0_i32, %c0_i32_0 : i32, i32
  }
  func.func @transform_5(%arg0: i32) -> (i32, i32) {
    %c0_i32 = arith.constant 0 : i32
    %c0_i32_0 = arith.constant 0 : i32
    %c0_i32_1 = arith.constant 0 : i32
    return %c0_i32, %c0_i32_0 : i32, i32
  }
  func.func @transform_6(%arg0: i32) -> (i32, i32) {
    %c0_i32 = arith.constant 0 : i32
    %c0_i32_0 = arith.constant 0 : i32
    %c0_i32_1 = arith.constant 0 : i32
    return %c0_i32, %c0_i32_0 : i32, i32
  }
  func.func @transform_7(%arg0: i32) -> (i32, i32) {
    %c0_i32 = arith.constant 0 : i32
    %c0_i32_0 = arith.constant 0 : i32
    return %arg0, %c0_i32 : i32, i32
  }
}

</mosaic_0001>

<bundles_post_ra>
// kernel: tpu_custom_call.1
= control target key start
LH: loop header
LB: loop body
LE: loop exit
PB: predicated region body
PF: predicated region fallthrough
CT: control target
= control target key end

     0   :  { %12 = vsyncpa [#allocation3], 0  ;;  %s470_s0 = inlined_call_operand.hbm [shape: f32[16,16], index: 0, kind: input, shape index: {}]   ;;  %s471_s1 = inlined_call_operand.hbm [shape: f32[16,128], index: 1, kind: input, shape index: {}]   ;;  %s472_s2 = inlined_call_operand.vmem [shape: f32[1,128], index: 2, kind: input, shape index: {}]   ;;  %s473_s3 = inlined_call_operand.vmem [shape: f32[1,128], index: 3, kind: input, shape index: {}]   ;;  %s474_s4 = inlined_call_operand.vmem [shape: f32[1,128], index: 4, kind: input, shape index: {}]   ;;  %s475_s5 = inlined_call_operand.vmem [shape: f32[1,128], index: 5, kind: input, shape index: {}]   ;;  %s476_s6 = inlined_call_operand.vmem [shape: f32[1,128], index: 6, kind: input, shape index: {}]   ;;  %s477_s7 = inlined_call_operand.hbm [shape: f32[16,128], index: 7, kind: output, shape index: {}]  }
   0x1   :  { %13 = vsyncpa [#allocation6], 0 }
   0x2   :  { %14 = vsyncpa [#allocation4], 0  ;;  %s365_s24 = smov [#allocation2]   ;;  %s293_s28 = scalar_lea.hbm %s470_s0, 256 }
   0x3   :  { %s20_s25 = sshll.u32 %s365_s24, 4  ;;  %p294_p0 = scmp.ne.s32.totalorder %s470_s0, %s293_s28  ;;  %s21_s25 = int_to_ptr.vmem [resolvable:$true] %s20_s25 }
   0x4   :  { %p297_p1 = scmp.lt.u32.totalorder %s293_s28, %s470_s0 }
   0x6   :  { %p299_p2 = pnand %p297_p1, %p294_p0 }
   0x8   :  { %302 = shalt.err (!%p299_p2)
}
   0x9   :  { %s303_s10 = scalar_lea.vmem %s21_s25, 256  ;;  %p308_p4 = scmp.lt.s32.totalorder %s21_s25, %s21_s25 }
   0xa   :  { %p304_p3 = scmp.ne.s32.totalorder %s21_s25, %s303_s10  ;;  %p309_p5 = scmp.lt.s32.totalorder %s303_s10, %s303_s10 }
   0xc   :  { %p310_p6 = por %p309_p5, %p308_p4 }
   0xe   :  { %p311_p7 = pnand %p310_p6, %p304_p3 }
  0x10   :  { %314 = shalt.err (!%p311_p7)
}
  0x11   :  { %s366_s11 = smov 128   ;;  %s367_s12 = smov 8  }
  0x12   :  { %26 = dma.hbm_to_vmem [thread:$0]  %s470_s0, 256, %s21_s25, [#allocation3], %s366_s11, %s366_s11, %s367_s12  }
  0x13   :  { %s368_s15 = smov [#allocation5]   ;;  %s315_s19 = scalar_lea.hbm %s471_s1, 256 }
  0x14   :  { %s32_s16 = sshll.u32 %s368_s15, 4  ;;  %p316_p8 = scmp.ne.s32.totalorder %s471_s1, %s315_s19  ;;  %s33_s16 = int_to_ptr.vmem [resolvable:$true] %s32_s16 }
  0x15   :  { %p319_p9 = scmp.lt.u32.totalorder %s315_s19, %s471_s1 }
  0x17   :  { %p321_p10 = pnand %p319_p9, %p316_p8 }
  0x19   :  { %324 = shalt.err (!%p321_p10)
}
  0x1a   :  { %s325_s24 = scalar_lea.vmem %s33_s16, 256  ;;  %p330_p12 = scmp.lt.s32.totalorder %s33_s16, %s33_s16 }
  0x1b   :  { %p326_p11 = scmp.ne.s32.totalorder %s33_s16, %s325_s24  ;;  %p331_p13 = scmp.lt.s32.totalorder %s325_s24, %s325_s24 }
  0x1d   :  { %p332_p0 = por %p331_p13, %p330_p12 }
  0x1f   :  { %p333_p1 = pnand %p332_p0, %p326_p11 }
  0x21   :  { %336 = shalt.err (!%p333_p1)
}
  0x22   :  { %38 = dma.hbm_to_vmem [thread:$0]  %s471_s1, 256, %s33_s16, [#allocation6], %s366_s11, %s366_s11, %s367_s12  }
  0x23   :  { %359 = dma.done.wait [#allocation3], 256  }
  0x24   :  { %360 = vsyncadd [#allocation3], 4294967040 }
  0x25   :  { %361 = dma.done.wait [#allocation6], 256  }
  0x26   :  { %362 = vsyncadd [#allocation6], 4294967040  ;;  %vm66_vm0 = vcmask 130048   ;;  %v57_v0 = vld [vmem:[#allocation5] sm:$0xff]  ;;  %v58_v1 = vld [vmem:[#allocation5 + $0x8] sm:$0xff]  ;;  %s369_s9 = smov [#allocation7]  }
  0x27   :  { %v55_v2 = vld [vmem:[#allocation2] sm:$0xff]  ;;  %v276_v3 = vpack.c.bf16 %v58_v1, %v57_v0  ;;  %v56_v4 = vld [vmem:[#allocation2 + $0x8] sm:$0xff]  ;;  %s245_s10 = sshll.u32 %s369_s9, 4  ;;  %s246_s10 = int_to_ptr.vmem [resolvable:$true] %s245_s10 }
  0x28   :  { %273 = vmatprep.mubr.msk.f32.mxu0 %vm66_vm0, %v55_v2  ;;  %v258_v5 = vld [vmem:[%s472_s2] ss:$0 sm:$0xff]  ;;  %s337_s13 = scalar_lea.vmem %s246_s10, 256  ;;  %p342_p3 = scmp.lt.s32.totalorder %s246_s10, %s246_s10 }
  0x29   :  { %277 = vmatprep.subr.bf16.mxu0 %v276_v3  ;;  %v261_v28 = vld [vmem:[%s473_s3] ss:$0 sm:$0xff]  ;;  %p338_p2 = scmp.ne.s32.totalorder %s246_s10, %s337_s13  ;;  %p343_p4 = scmp.lt.s32.totalorder %s337_s13, %s337_s13 }
  0x2a   :  { %279 = vmatpush3.bf16.msra.mxu0 %v276_v3  ;;  %v262_v30 = vld [vmem:[%s474_s4] ss:$0 sm:$0xff] }
  0x2b   :  { %v263_v58 = vld [vmem:[%s475_s5] ss:$0 sm:$0xff]  ;;  %p344_p5 = por %p343_p4, %p342_p3 }
  0x2c   :  { %v264_v60 = vld [vmem:[%s476_s6] ss:$0 sm:$0xff] }
  0x2d   :  { %274 = vmatmul.mubr.msk.f32.vlgmr.msra.gmra.mrb[0].mxu0 %vm66_vm0, %v56_v4  ;;  %p345_p6 = pnand %p344_p5, %p338_p2 }
 0x100   :  { %v275_v6 = vpop.f32.mrb[0].mxu0 }
 0x101   :  { %v139_v7 = vpop.f32.mrb[1].mxu0  ;;  %v145_v9 = vadd.f32 %v275_v6, %v258_v5 }
 0x102   :  { %v140_v8 = vadd.f32 %v258_v5, %v139_v7 }
 0x103   :  { %v155_v11 = vmul.f32 %v145_v9, %v145_v9 }
 0x104   :  { %148 = vadd.xlane.f32.xlu0 %v140_v8  ;;  %v154_v10 = vmul.f32 %v140_v8, %v140_v8 }
 0x106   :  { %156 = vadd.xlane.f32.xlu1 %v154_v10 }
 0x108   :  { %150 = vadd.xlane.f32.xlu0 %v145_v9 }
 0x10a   :  { %158 = vadd.xlane.f32.xlu1 %v155_v11 }
 0x191   :  { %v149_v12 = vpop.xlane.xlu0 %148 }
 0x192   :  { %v152_v13 = vmul.f32 0.03125, %v149_v12 }
 0x193   :  { %v157_v14 = vpop.xlane.xlu1 %156 }
 0x194   :  { %v162_v15 = vmul.f32 %v152_v13, %v152_v13  ;;  %v160_v16 = vmul.f32 0.03125, %v157_v14  ;;  %v166_v26 = vsub.f32 %v140_v8, %v152_v13 }
 0x195   :  { %v151_v17 = vpop.xlane.xlu0 %150 }
 0x196   :  { %v164_v18 = vsub.f32 %v160_v16, %v162_v15  ;;  %v153_v19 = vmul.f32 0.03125, %v151_v17 }
 0x197   :  { %v159_v20 = vpop.xlane.xlu1 %158 }
 0x198   :  { %v168_v21 = vadd.f32 1e-05, %v164_v18  ;;  %v163_v22 = vmul.f32 %v153_v19, %v153_v19  ;;  %v161_v23 = vmul.f32 0.03125, %v159_v20  ;;  %v167_v31 = vsub.f32 %v145_v9, %v153_v19 }
 0x19a   :  { %285 = vrsqrt.f32 %v168_v21  ;;  %v165_v24 = vsub.f32 %v161_v23, %v163_v22 }
 0x19c   :  { %v169_v25 = vadd.f32 1e-05, %v165_v24 }
 0x19e   :  { %287 = vrsqrt.f32 %v169_v25 }
 0x1a4   :  { %v286_v27 = vpop.eup %285 }
 0x1a5   :  { %v172_v29 = vmul.f32 %v286_v27, %v166_v26 }
 0x1a7   :  { %v181_v32 = vmul.f32 %v261_v28, %v172_v29 }
 0x1a8   :  { %v288_v33 = vpop.eup %287 }
 0x1a9   :  { %v190_v34 = vadd.f32 %v262_v30, %v181_v32  ;;  %v173_v35 = vmul.f32 %v288_v33, %v167_v31 }
 0x1ab   :  { %v192_v36 = vmul.f32 5.656854, %v190_v34  ;;  %v182_v37 = vmul.f32 %v261_v28, %v173_v35 }
 0x1ad   :  { %194 = vadd.xlane.f32.xlu0 %v192_v36  ;;  %v191_v38 = vadd.f32 %v262_v30, %v182_v37  ;;  %v200_v39 = vmul.f32 %v192_v36, %v192_v36 }
 0x1af   :  { %v193_v40 = vmul.f32 5.656854, %v191_v38 }
 0x1b1   :  { %202 = vadd.xlane.f32.xlu0 %v200_v39  ;;  %196 = vadd.xlane.f32.xlu1 %v193_v40  ;;  %v201_v41 = vmul.f32 %v193_v40, %v193_v40 }
 0x1b5   :  { %204 = vadd.xlane.f32.xlu1 %v201_v41 }
 0x23a   :  { %v195_v42 = vpop.xlane.xlu0 %194 }
 0x23b   :  { %v198_v43 = vmul.f32 0.03125, %v195_v42 }
 0x23d   :  { %v208_v46 = vmul.f32 %v198_v43, %v198_v43  ;;  %v212_v56 = vsub.f32 %v192_v36, %v198_v43 }
 0x23e   :  { %v203_v44 = vpop.xlane.xlu0 %202  ;;  %v197_v45 = vpop.xlane.xlu1 %196 }
 0x23f   :  { %v206_v47 = vmul.f32 0.03125, %v203_v44  ;;  %v199_v48 = vmul.f32 0.03125, %v197_v45 }
 0x241   :  { %v210_v49 = vsub.f32 %v206_v47, %v208_v46  ;;  %v209_v52 = vmul.f32 %v199_v48, %v199_v48  ;;  %v213_v61 = vsub.f32 %v193_v40, %v199_v48 }
 0x242   :  { %v205_v50 = vpop.xlane.xlu1 %204 }
 0x243   :  { %v214_v51 = vadd.f32 1e-05, %v210_v49  ;;  %v207_v53 = vmul.f32 0.03125, %v205_v50 }
 0x245   :  { %289 = vrsqrt.f32 %v214_v51  ;;  %v211_v54 = vsub.f32 %v207_v53, %v209_v52 }
 0x247   :  { %v215_v55 = vadd.f32 1e-05, %v211_v54 }
 0x249   :  { %291 = vrsqrt.f32 %v215_v55 }
 0x24f   :  { %v290_v57 = vpop.eup %289 }
 0x250   :  { %v218_v59 = vmul.f32 %v290_v57, %v212_v56 }
 0x252   :  { %v227_v62 = vmul.f32 %v263_v58, %v218_v59 }
 0x253   :  { %v292_v63 = vpop.eup %291 }
 0x254   :  { %v219_v0 = vmul.f32 %v292_v63, %v213_v61  ;;  %v236_v1 = vadd.f32 %v264_v60, %v227_v62 }
 0x256   :  { %v228_v2 = vmul.f32 %v263_v58, %v219_v0  ;;  %238 = vst [vmem:[#allocation7] sm:$0xff] %v236_v1 }
 0x258   :  { %v237_v3 = vadd.f32 %v264_v60, %v228_v2 }
 0x25a   :  { %239 = vst [vmem:[#allocation7 + $0x8] sm:$0xff] %v237_v3 }
 0x25b   :  { %348 = shalt.err (!%p345_p6)
}
 0x25c   :  { %s349_s14 = scalar_lea.hbm %s477_s7, 256 }
 0x25d   :  { %p350_p7 = scmp.ne.s32.totalorder %s477_s7, %s349_s14  ;;  %p353_p8 = scmp.lt.u32.totalorder %s349_s14, %s477_s7 }
 0x25f   :  { %p355_p9 = pnand %p353_p8, %p350_p7 }
 0x261   :  { %358 = shalt.err (!%p355_p9)
}
 0x262   :  { %251 = dma.vmem_to_hbm [thread:$0]  %s246_s10, 256, %s477_s7, [#allocation4], %s366_s11, %s366_s11, %s367_s12  }
 0x263   :  { %363 = dma.done.wait [#allocation4], 256  }
 0x264   :  { %364 = vsyncadd [#allocation4], 4294967040 }
 0x265   :  { %255 = vsyncpa [#allocation3], 1 }
 0x266   :  { %256 = vsyncpa [#allocation6], 1 }
 0x267   :  { %257 = vsyncpa [#allocation4], 1 }

</bundles_post_ra>
